<compile_context>
chip_gen: v5e
topology: v5e:2x2
jax: 0.10.0
libtpu: 0.0.40
codegen_flags: <defaults>
</compile_context>

<pallas_src>
import jax
import jax.numpy as jnp
from jax.experimental import pallas as pl
from jax.experimental.pallas import tpu as pltpu

LANE = 128
SUBLANE = 8


def _round_up(x, m):
    return (x + m - 1) // m * m


def _elu(v):
    # ELU(alpha=1): v if v > 0 else exp(v) - 1 (clamped exp argument).
    return jnp.where(v > 0.0, v, jnp.exp(jnp.minimum(v, 0.0)) - 1.0)


def _fold_bn(gamma, beta, mean, var, eps=1e-5):
    scale = gamma / jnp.sqrt(var + eps)
    shift = beta - mean * scale
    return scale, shift


def _contract_kernel(xe_ref, xo_ref, w5_ref, w3a_ref, w3b_ref,
                     s1_ref, b1_ref, s2_ref, b2_ref, s3_ref, b3_ref,
                     o_ref, pad_ref):
    l_out, c_out = o_ref.shape

    # ---- down conv: kernel 5, stride 2, padding 2 -------------------------------------
    # x is pre-padded by 2 rows and de-interleaved into even/odd phases, so tap k needs
    # rows [k//2, k//2 + l_out) of phase (k % 2): contiguous VMEM loads only.
    phases = (xe_ref, xo_ref)
    h = jnp.zeros((l_out, c_out), jnp.float32)
    for k in range(5):
        xk = phases[k % 2][pl.ds(k // 2, l_out), :]
        h = h + jnp.dot(xk, w5_ref[k], preferred_element_type=jnp.float32)
    h = _elu(h * s1_ref[...] + b1_ref[...])            # folded BatchNorm1d + ELU

    # ---- 3-tap "same" conv via a zero-padded scratch slab ------------------------------
    def conv3(a, w_ref):
        pad_ref[...] = jnp.zeros_like(pad_ref)
        pad_ref[pl.ds(1, l_out), :] = a                # rows 1..l_out hold a, edges stay 0
        acc = jnp.zeros((l_out, c_out), jnp.float32)
        for k in range(3):
            acc = acc + jnp.dot(pad_ref[pl.ds(k, l_out), :], w_ref[k],
                                preferred_element_type=jnp.float32)
        return acc

    # ---- ResConv ------------------------------------------------------------------------
    t = _elu(conv3(h, w3a_ref) * s2_ref[...] + b2_ref[...])   # conv_block: conv3 -> BN -> ELU
    r = h + conv3(t, w3b_ref)                                 # residual conv
    out = _elu(r * s3_ref[...] + b3_ref[...])                 # actbatch: BN -> ELU
    o_ref[...] = out.astype(o_ref.dtype)                      # single lane-dense store


def contract_forward(x, w5, w3a, w3b, bn1, bn2, bn3):
    """x: (N, Cin, L) f32.  w5: (Cout, Cin, 5).  w3a/w3b: (Cout, Cout, 3).
    bn*: (gamma, beta, running_mean, running_var), each (Cout,)."""
    n, c_in, length = x.shape
    c_out = w5.shape[0]
    l_out = (length - 1) // 2 + 1                      # conv k=5, stride=2, pad=2

    cin_p = _round_up(c_in, LANE)
    cout_p = _round_up(c_out, LANE)
    l_phase = _round_up(l_out + 2, SUBLANE)            # rows needed per stride-2 phase
    l_total = 2 * l_phase
    l_pad3 = _round_up(l_out + 2, SUBLANE)             # scratch rows for the k=3 convs

    # ---- host-side layout plumbing: channels -> lanes, zero pad, de-interleave ---------
    xt = jnp.transpose(x, (0, 2, 1))                                    # (N, L, Cin)
    xt = jnp.pad(xt, ((0, 0), (2, l_total - length - 2), (0, cin_p - c_in)))
    x_even = xt[:, 0::2, :]                                             # (N, l_phase, cin_p)
    x_odd = xt[:, 1::2, :]

    def pad_w(w, ci, ci_p):                                             # (Cout,Ci,K)->(K,ci_p,cout_p)
        wt = jnp.transpose(w, (2, 1, 0))
        return jnp.pad(wt, ((0, 0), (0, ci_p - ci), (0, cout_p - c_out)))

    w5_p = pad_w(w5, c_in, cin_p)
    w3a_p = pad_w(w3a, c_out, cout_p)
    w3b_p = pad_w(w3b, c_out, cout_p)

    def pad_bn(bn):
        s, b = _fold_bn(*bn)
        pad = (0, cout_p - c_out)
        return (jnp.pad(s, pad).reshape(1, cout_p),
                jnp.pad(b, pad).reshape(1, cout_p))

    (s1, b1), (s2, b2), (s3, b3) = pad_bn(bn1), pad_bn(bn2), pad_bn(bn3)

    x_spec = pl.BlockSpec((None, l_phase, cin_p), lambda i: (i, 0, 0))
    w_spec = lambda shape: pl.BlockSpec(shape, lambda i: (0, 0, 0))
    v_spec = pl.BlockSpec((1, cout_p), lambda i: (0, 0))

    out_p = pl.pallas_call(
        _contract_kernel,
        out_shape=jax.ShapeDtypeStruct((n, l_out, cout_p), x.dtype),
        grid_spec=pltpu.PrefetchScalarGridSpec(
            num_scalar_prefetch=0,
            grid=(n,),
            in_specs=[
                x_spec, x_spec,
                w_spec(w5_p.shape), w_spec(w3a_p.shape), w_spec(w3b_p.shape),
                v_spec, v_spec, v_spec, v_spec, v_spec, v_spec,
            ],
            out_specs=pl.BlockSpec((None, l_out, cout_p), lambda i: (i, 0, 0)),
            scratch_shapes=[pltpu.VMEM((l_pad3, cout_p), jnp.float32)],
        ),
        compiler_params=pltpu.CompilerParams(dimension_semantics=("parallel",)),
    )(x_even, x_odd, w5_p, w3a_p, w3b_p, s1, b1, s2, b2, s3, b3)

    # slice off channel padding and return PyTorch layout (N, Cout, L_out)
    return jnp.transpose(out_p[:, :, :c_out], (0, 2, 1))


def reference_forward(x, w5, w3a, w3b, bn1, bn2, bn3):
    def conv1d(v, w, stride, pad):
        return jax.lax.conv_general_dilated(
            v, w, window_strides=(stride,), padding=[(pad, pad)],
            dimension_numbers=("NCH", "OIH", "NCH"),
            precision=jax.lax.Precision.HIGHEST)

    def bn_elu(v, bn):
        s, b = _fold_bn(*bn)
        return _elu(v * s[None, :, None] + b[None, :, None])

    h = bn_elu(conv1d(x, w5, 2, 2), bn1)                    # down conv + BN + ELU
    t = bn_elu(conv1d(h, w3a, 1, 1), bn2)                   # ResConv.conv_block
    r = h + conv1d(t, w3b, 1, 1)                            # residual
    return bn_elu(r, bn3)                                   # ResConv.actbatch


if __name__ == "__main__":
    key = jax.random.PRNGKey(0)
    keys = jax.random.split(key, 8)
    N, C_IN, C_OUT, L = 2, 4, 8, 16

    x = jax.random.normal(keys[0], (N, C_IN, L), jnp.float32)
    w5 = 0.2 * jax.random.normal(keys[1], (C_OUT, C_IN, 5), jnp.float32)
    w3a = 0.2 * jax.random.normal(keys[2], (C_OUT, C_OUT, 3), jnp.float32)
    w3b = 0.2 * jax.random.normal(keys[3], (C_OUT, C_OUT, 3), jnp.float32)

    def bn_params(k):
        k1, k2, k3, k4 = jax.random.split(k, 4)
        gamma = jax.random.uniform(k1, (C_OUT,), jnp.float32, 0.5, 1.5)
        beta = 0.1 * jax.random.normal(k2, (C_OUT,), jnp.float32)
        mean = 0.1 * jax.random.normal(k3, (C_OUT,), jnp.float32)
        var = jax.random.uniform(k4, (C_OUT,), jnp.float32, 0.5, 1.5)
        return gamma, beta, mean, var

    bn1, bn2, bn3 = bn_params(keys[4]), bn_params(keys[5]), bn_params(keys[6])

    out = contract_forward(x, w5, w3a, w3b, bn1, bn2, bn3)
    out = jax.block_until_ready(out)

    ref = reference_forward(x, w5, w3a, w3b, bn1, bn2, bn3)
    l_out = (L - 1) // 2 + 1
    assert out.shape == (N, C_OUT, l_out), out.shape
    assert jnp.allclose(out, ref, atol=1e-4, rtol=1e-4), float(jnp.max(jnp.abs(out - ref)))
    print("KERNEL_OK")
</pallas_src>

<mosaic_0001>
module attributes {stable_mosaic.version = 11 : i64} {
  func.func @_contract_kernel(%arg0: i32, %arg1: memref<1x16x128xf32, #tpu.memory_space<vmem>>, %arg2: memref<1x16x128xf32, #tpu.memory_space<vmem>>, %arg3: memref<5x128x128xf32, #tpu.memory_space<vmem>>, %arg4: memref<3x128x128xf32, #tpu.memory_space<vmem>>, %arg5: memref<3x128x128xf32, #tpu.memory_space<vmem>>, %arg6: memref<1x128xf32, #tpu.memory_space<vmem>>, %arg7: memref<1x128xf32, #tpu.memory_space<vmem>>, %arg8: memref<1x128xf32, #tpu.memory_space<vmem>>, %arg9: memref<1x128xf32, #tpu.memory_space<vmem>>, %arg10: memref<1x128xf32, #tpu.memory_space<vmem>>, %arg11: memref<1x128xf32, #tpu.memory_space<vmem>>, %arg12: memref<1x8x128xf32, #tpu.memory_space<vmem>>, %arg13: memref<16x128xf32, #tpu.memory_space<vmem>>) attributes {dimension_semantics = [#tpu.dimension_semantics<parallel>], iteration_bounds = array<i64: 2>, scalar_prefetch = 0 : i64, scratch_operands = 1 : i64, tpu.core_type = #tpu.core_type<tc>, window_params = [{transform_indices = @transform_0, window_bounds = array<i64: 1, 16, 128>}, {transform_indices = @transform_1, window_bounds = array<i64: 1, 16, 128>}, {pipeline_mode = #tpu.pipeline_mode<synchronous>, transform_indices = @transform_2, window_bounds = array<i64: 5, 128, 128>}, {pipeline_mode = #tpu.pipeline_mode<synchronous>, transform_indices = @transform_3, window_bounds = array<i64: 3, 128, 128>}, {pipeline_mode = #tpu.pipeline_mode<synchronous>, transform_indices = @transform_4, window_bounds = array<i64: 3, 128, 128>}, {pipeline_mode = #tpu.pipeline_mode<synchronous>, transform_indices = @transform_5, window_bounds = array<i64: 1, 128>}, {pipeline_mode = #tpu.pipeline_mode<synchronous>, transform_indices = @transform_6, window_bounds = array<i64: 1, 128>}, {pipeline_mode = #tpu.pipeline_mode<synchronous>, transform_indices = @transform_7, window_bounds = array<i64: 1, 128>}, {pipeline_mode = #tpu.pipeline_mode<synchronous>, transform_indices = @transform_8, window_bounds = array<i64: 1, 128>}, {pipeline_mode = #tpu.pipeline_mode<synchronous>, transform_indices = @transform_9, window_bounds = array<i64: 1, 128>}, {pipeline_mode = #tpu.pipeline_mode<synchronous>, transform_indices = @transform_10, window_bounds = array<i64: 1, 128>}, {transform_indices = @transform_11, window_bounds = array<i64: 1, 8, 128>}]} {
    %cst = arith.constant 0.000000e+00 : f32
    %0 = vector.broadcast %cst : f32 to vector<8x128xf32>
    %c0 = arith.constant 0 : index
    %c0_0 = arith.constant 0 : index
    %c0_1 = arith.constant 0 : index
    %1 = vector.load %arg1[%c0, %c0_0, %c0_1] : memref<1x16x128xf32, #tpu.memory_space<vmem>>, vector<1x8x128xf32>
    %2 = vector.shape_cast %1 : vector<1x8x128xf32> to vector<8x128xf32>
    %c0_2 = arith.constant 0 : index
    %c0_3 = arith.constant 0 : index
    %c0_4 = arith.constant 0 : index
    %3 = vector.load %arg3[%c0_2, %c0_3, %c0_4] : memref<5x128x128xf32, #tpu.memory_space<vmem>>, vector<1x128x128xf32>
    %4 = vector.shape_cast %3 : vector<1x128x128xf32> to vector<128x128xf32>
    %cst_5 = arith.constant dense<0.000000e+00> : vector<8x128xf32>
    %5 = tpu.matmul %2, %4, %cst_5 {dimension_numbers = #tpu.dot_dimension_numbers<[1], [0], [0], [1], [0, 0, 1, 1], [], []>} : vector<8x128xf32>, vector<128x128xf32>, vector<8x128xf32> -> vector<8x128xf32>
    %6 = arith.addf %0, %5 : vector<8x128xf32>
    %c0_6 = arith.constant 0 : index
    %c0_7 = arith.constant 0 : index
    %c0_8 = arith.constant 0 : index
    %7 = vector.load %arg2[%c0_6, %c0_7, %c0_8] : memref<1x16x128xf32, #tpu.memory_space<vmem>>, vector<1x8x128xf32>
    %8 = vector.shape_cast %7 : vector<1x8x128xf32> to vector<8x128xf32>
    %c1 = arith.constant 1 : index
    %c0_9 = arith.constant 0 : index
    %c0_10 = arith.constant 0 : index
    %9 = vector.load %arg3[%c1, %c0_9, %c0_10] : memref<5x128x128xf32, #tpu.memory_space<vmem>>, vector<1x128x128xf32>
    %10 = vector.shape_cast %9 : vector<1x128x128xf32> to vector<128x128xf32>
    %cst_11 = arith.constant dense<0.000000e+00> : vector<8x128xf32>
    %11 = tpu.matmul %8, %10, %cst_11 {dimension_numbers = #tpu.dot_dimension_numbers<[1], [0], [0], [1], [0, 0, 1, 1], [], []>} : vector<8x128xf32>, vector<128x128xf32>, vector<8x128xf32> -> vector<8x128xf32>
    %12 = arith.addf %6, %11 : vector<8x128xf32>
    %c0_12 = arith.constant 0 : index
    %c1_13 = arith.constant 1 : index
    %c0_14 = arith.constant 0 : index
    %13 = vector.load %arg1[%c0_12, %c1_13, %c0_14] : memref<1x16x128xf32, #tpu.memory_space<vmem>>, vector<1x8x128xf32>
    %14 = vector.shape_cast %13 : vector<1x8x128xf32> to vector<8x128xf32>
    %c2 = arith.constant 2 : index
    %c0_15 = arith.constant 0 : index
    %c0_16 = arith.constant 0 : index
    %15 = vector.load %arg3[%c2, %c0_15, %c0_16] : memref<5x128x128xf32, #tpu.memory_space<vmem>>, vector<1x128x128xf32>
    %16 = vector.shape_cast %15 : vector<1x128x128xf32> to vector<128x128xf32>
    %cst_17 = arith.constant dense<0.000000e+00> : vector<8x128xf32>
    %17 = tpu.matmul %14, %16, %cst_17 {dimension_numbers = #tpu.dot_dimension_numbers<[1], [0], [0], [1], [0, 0, 1, 1], [], []>} : vector<8x128xf32>, vector<128x128xf32>, vector<8x128xf32> -> vector<8x128xf32>
    %18 = arith.addf %12, %17 : vector<8x128xf32>
    %c0_18 = arith.constant 0 : index
    %c1_19 = arith.constant 1 : index
    %c0_20 = arith.constant 0 : index
    %19 = vector.load %arg2[%c0_18, %c1_19, %c0_20] : memref<1x16x128xf32, #tpu.memory_space<vmem>>, vector<1x8x128xf32>
    %20 = vector.shape_cast %19 : vector<1x8x128xf32> to vector<8x128xf32>
    %c3 = arith.constant 3 : index
    %c0_21 = arith.constant 0 : index
    %c0_22 = arith.constant 0 : index
    %21 = vector.load %arg3[%c3, %c0_21, %c0_22] : memref<5x128x128xf32, #tpu.memory_space<vmem>>, vector<1x128x128xf32>
    %22 = vector.shape_cast %21 : vector<1x128x128xf32> to vector<128x128xf32>
    %cst_23 = arith.constant dense<0.000000e+00> : vector<8x128xf32>
    %23 = tpu.matmul %20, %22, %cst_23 {dimension_numbers = #tpu.dot_dimension_numbers<[1], [0], [0], [1], [0, 0, 1, 1], [], []>} : vector<8x128xf32>, vector<128x128xf32>, vector<8x128xf32> -> vector<8x128xf32>
    %24 = arith.addf %18, %23 : vector<8x128xf32>
    %c0_24 = arith.constant 0 : index
    %c2_25 = arith.constant 2 : index
    %c0_26 = arith.constant 0 : index
    %25 = vector.load %arg1[%c0_24, %c2_25, %c0_26] : memref<1x16x128xf32, #tpu.memory_space<vmem>>, vector<1x8x128xf32>
    %26 = vector.shape_cast %25 : vector<1x8x128xf32> to vector<8x128xf32>
    %c4 = arith.constant 4 : index
    %c0_27 = arith.constant 0 : index
    %c0_28 = arith.constant 0 : index
    %27 = vector.load %arg3[%c4, %c0_27, %c0_28] : memref<5x128x128xf32, #tpu.memory_space<vmem>>, vector<1x128x128xf32>
    %28 = vector.shape_cast %27 : vector<1x128x128xf32> to vector<128x128xf32>
    %cst_29 = arith.constant dense<0.000000e+00> : vector<8x128xf32>
    %29 = tpu.matmul %26, %28, %cst_29 {dimension_numbers = #tpu.dot_dimension_numbers<[1], [0], [0], [1], [0, 0, 1, 1], [], []>} : vector<8x128xf32>, vector<128x128xf32>, vector<8x128xf32> -> vector<8x128xf32>
    %30 = arith.addf %24, %29 : vector<8x128xf32>
    %c0_30 = arith.constant 0 : index
    %c0_31 = arith.constant 0 : index
    %31 = vector.load %arg6[%c0_30, %c0_31] : memref<1x128xf32, #tpu.memory_space<vmem>>, vector<1x128xf32>
    %32 = vector.broadcast %31 : vector<1x128xf32> to vector<8x128xf32>
    %33 = arith.mulf %30, %32 : vector<8x128xf32>
    %c0_32 = arith.constant 0 : index
    %c0_33 = arith.constant 0 : index
    %34 = vector.load %arg7[%c0_32, %c0_33] : memref<1x128xf32, #tpu.memory_space<vmem>>, vector<1x128xf32>
    %35 = vector.broadcast %34 : vector<1x128xf32> to vector<8x128xf32>
    %36 = arith.addf %33, %35 : vector<8x128xf32>
    %cst_34 = arith.constant 0.000000e+00 : f32
    %37 = vector.broadcast %cst_34 : f32 to vector<8x128xf32>
    %38 = arith.cmpf ogt, %36, %37 : vector<8x128xf32>
    %cst_35 = arith.constant 0.000000e+00 : f32
    %39 = vector.broadcast %cst_35 : f32 to vector<8x128xf32>
    %40 = arith.minimumf %36, %39 : vector<8x128xf32>
    %41 = math.exp %40 : vector<8x128xf32>
    %cst_36 = arith.constant 1.000000e+00 : f32
    %42 = vector.broadcast %cst_36 : f32 to vector<8x128xf32>
    %43 = arith.subf %41, %42 : vector<8x128xf32>
    %44 = arith.select %38, %36, %43 : vector<8x128xi1>, vector<8x128xf32>
    %cst_37 = arith.constant 0.000000e+00 : f32
    %45 = vector.broadcast %cst_37 : f32 to vector<16x128xf32>
    %c0_38 = arith.constant 0 : index
    %c0_39 = arith.constant 0 : index
    %46 = vector.load %arg13[%c0_38, %c0_39] : memref<16x128xf32, #tpu.memory_space<vmem>>, vector<16x128xf32>
    tpu.vector_store %arg13[%c0_38, %c0_39], %45 {strides = array<i32>} : memref<16x128xf32, #tpu.memory_space<vmem>>, vector<16x128xf32>,
    %c1_40 = arith.constant 1 : index
    %c0_41 = arith.constant 0 : index
    %47 = vector.load %arg13[%c1_40, %c0_41] : memref<16x128xf32, #tpu.memory_space<vmem>>, vector<8x128xf32>
    tpu.vector_store %arg13[%c1_40, %c0_41], %44 {strides = array<i32>} : memref<16x128xf32, #tpu.memory_space<vmem>>, vector<8x128xf32>,
    %cst_42 = arith.constant 0.000000e+00 : f32
    %48 = vector.broadcast %cst_42 : f32 to vector<8x128xf32>
    %c0_43 = arith.constant 0 : index
    %c0_44 = arith.constant 0 : index
    %49 = vector.load %arg13[%c0_43, %c0_44] : memref<16x128xf32, #tpu.memory_space<vmem>>, vector<8x128xf32>
    %c0_45 = arith.constant 0 : index
    %c0_46 = arith.constant 0 : index
    %c0_47 = arith.constant 0 : index
    %50 = vector.load %arg4[%c0_45, %c0_46, %c0_47] : memref<3x128x128xf32, #tpu.memory_space<vmem>>, vector<1x128x128xf32>
    %51 = vector.shape_cast %50 : vector<1x128x128xf32> to vector<128x128xf32>
    %cst_48 = arith.constant dense<0.000000e+00> : vector<8x128xf32>
    %52 = tpu.matmul %49, %51, %cst_48 {dimension_numbers = #tpu.dot_dimension_numbers<[1], [0], [0], [1], [0, 0, 1, 1], [], []>} : vector<8x128xf32>, vector<128x128xf32>, vector<8x128xf32> -> vector<8x128xf32>
    %53 = arith.addf %48, %52 : vector<8x128xf32>
    %c1_49 = arith.constant 1 : index
    %c0_50 = arith.constant 0 : index
    %54 = vector.load %arg13[%c1_49, %c0_50] : memref<16x128xf32, #tpu.memory_space<vmem>>, vector<8x128xf32>
    %c1_51 = arith.constant 1 : index
    %c0_52 = arith.constant 0 : index
    %c0_53 = arith.constant 0 : index
    %55 = vector.load %arg4[%c1_51, %c0_52, %c0_53] : memref<3x128x128xf32, #tpu.memory_space<vmem>>, vector<1x128x128xf32>
    %56 = vector.shape_cast %55 : vector<1x128x128xf32> to vector<128x128xf32>
    %cst_54 = arith.constant dense<0.000000e+00> : vector<8x128xf32>
    %57 = tpu.matmul %54, %56, %cst_54 {dimension_numbers = #tpu.dot_dimension_numbers<[1], [0], [0], [1], [0, 0, 1, 1], [], []>} : vector<8x128xf32>, vector<128x128xf32>, vector<8x128xf32> -> vector<8x128xf32>
    %58 = arith.addf %53, %57 : vector<8x128xf32>
    %c2_55 = arith.constant 2 : index
    %c0_56 = arith.constant 0 : index
    %59 = vector.load %arg13[%c2_55, %c0_56] : memref<16x128xf32, #tpu.memory_space<vmem>>, vector<8x128xf32>
    %c2_57 = arith.constant 2 : index
    %c0_58 = arith.constant 0 : index
    %c0_59 = arith.constant 0 : index
    %60 = vector.load %arg4[%c2_57, %c0_58, %c0_59] : memref<3x128x128xf32, #tpu.memory_space<vmem>>, vector<1x128x128xf32>
    %61 = vector.shape_cast %60 : vector<1x128x128xf32> to vector<128x128xf32>
    %cst_60 = arith.constant dense<0.000000e+00> : vector<8x128xf32>
    %62 = tpu.matmul %59, %61, %cst_60 {dimension_numbers = #tpu.dot_dimension_numbers<[1], [0], [0], [1], [0, 0, 1, 1], [], []>} : vector<8x128xf32>, vector<128x128xf32>, vector<8x128xf32> -> vector<8x128xf32>
    %63 = arith.addf %58, %62 : vector<8x128xf32>
    %c0_61 = arith.constant 0 : index
    %c0_62 = arith.constant 0 : index
    %64 = vector.load %arg8[%c0_61, %c0_62] : memref<1x128xf32, #tpu.memory_space<vmem>>, vector<1x128xf32>
    %65 = vector.broadcast %64 : vector<1x128xf32> to vector<8x128xf32>
    %66 = arith.mulf %63, %65 : vector<8x128xf32>
    %c0_63 = arith.constant 0 : index
    %c0_64 = arith.constant 0 : index
    %67 = vector.load %arg9[%c0_63, %c0_64] : memref<1x128xf32, #tpu.memory_space<vmem>>, vector<1x128xf32>
    %68 = vector.broadcast %67 : vector<1x128xf32> to vector<8x128xf32>
    %69 = arith.addf %66, %68 : vector<8x128xf32>
    %cst_65 = arith.constant 0.000000e+00 : f32
    %70 = vector.broadcast %cst_65 : f32 to vector<8x128xf32>
    %71 = arith.cmpf ogt, %69, %70 : vector<8x128xf32>
    %cst_66 = arith.constant 0.000000e+00 : f32
    %72 = vector.broadcast %cst_66 : f32 to vector<8x128xf32>
    %73 = arith.minimumf %69, %72 : vector<8x128xf32>
    %74 = math.exp %73 : vector<8x128xf32>
    %cst_67 = arith.constant 1.000000e+00 : f32
    %75 = vector.broadcast %cst_67 : f32 to vector<8x128xf32>
    %76 = arith.subf %74, %75 : vector<8x128xf32>
    %77 = arith.select %71, %69, %76 : vector<8x128xi1>, vector<8x128xf32>
    %cst_68 = arith.constant 0.000000e+00 : f32
    %78 = vector.broadcast %cst_68 : f32 to vector<16x128xf32>
    %c0_69 = arith.constant 0 : index
    %c0_70 = arith.constant 0 : index
    %79 = vector.load %arg13[%c0_69, %c0_70] : memref<16x128xf32, #tpu.memory_space<vmem>>, vector<16x128xf32>
    tpu.vector_store %arg13[%c0_69, %c0_70], %78 {strides = array<i32>} : memref<16x128xf32, #tpu.memory_space<vmem>>, vector<16x128xf32>,
    %c1_71 = arith.constant 1 : index
    %c0_72 = arith.constant 0 : index
    %80 = vector.load %arg13[%c1_71, %c0_72] : memref<16x128xf32, #tpu.memory_space<vmem>>, vector<8x128xf32>
    tpu.vector_store %arg13[%c1_71, %c0_72], %77 {strides = array<i32>} : memref<16x128xf32, #tpu.memory_space<vmem>>, vector<8x128xf32>,
    %cst_73 = arith.constant 0.000000e+00 : f32
    %81 = vector.broadcast %cst_73 : f32 to vector<8x128xf32>
    %c0_74 = arith.constant 0 : index
    %c0_75 = arith.constant 0 : index
    %82 = vector.load %arg13[%c0_74, %c0_75] : memref<16x128xf32, #tpu.memory_space<vmem>>, vector<8x128xf32>
    %c0_76 = arith.constant 0 : index
    %c0_77 = arith.constant 0 : index
    %c0_78 = arith.constant 0 : index
    %83 = vector.load %arg5[%c0_76, %c0_77, %c0_78] : memref<3x128x128xf32, #tpu.memory_space<vmem>>, vector<1x128x128xf32>
    %84 = vector.shape_cast %83 : vector<1x128x128xf32> to vector<128x128xf32>
    %cst_79 = arith.constant dense<0.000000e+00> : vector<8x128xf32>
    %85 = tpu.matmul %82, %84, %cst_79 {dimension_numbers = #tpu.dot_dimension_numbers<[1], [0], [0], [1], [0, 0, 1, 1], [], []>} : vector<8x128xf32>, vector<128x128xf32>, vector<8x128xf32> -> vector<8x128xf32>
    %86 = arith.addf %81, %85 : vector<8x128xf32>
    %c1_80 = arith.constant 1 : index
    %c0_81 = arith.constant 0 : index
    %87 = vector.load %arg13[%c1_80, %c0_81] : memref<16x128xf32, #tpu.memory_space<vmem>>, vector<8x128xf32>
    %c1_82 = arith.constant 1 : index
    %c0_83 = arith.constant 0 : index
    %c0_84 = arith.constant 0 : index
    %88 = vector.load %arg5[%c1_82, %c0_83, %c0_84] : memref<3x128x128xf32, #tpu.memory_space<vmem>>, vector<1x128x128xf32>
    %89 = vector.shape_cast %88 : vector<1x128x128xf32> to vector<128x128xf32>
    %cst_85 = arith.constant dense<0.000000e+00> : vector<8x128xf32>
    %90 = tpu.matmul %87, %89, %cst_85 {dimension_numbers = #tpu.dot_dimension_numbers<[1], [0], [0], [1], [0, 0, 1, 1], [], []>} : vector<8x128xf32>, vector<128x128xf32>, vector<8x128xf32> -> vector<8x128xf32>
    %91 = arith.addf %86, %90 : vector<8x128xf32>
    %c2_86 = arith.constant 2 : index
    %c0_87 = arith.constant 0 : index
    %92 = vector.load %arg13[%c2_86, %c0_87] : memref<16x128xf32, #tpu.memory_space<vmem>>, vector<8x128xf32>
    %c2_88 = arith.constant 2 : index
    %c0_89 = arith.constant 0 : index
    %c0_90 = arith.constant 0 : index
    %93 = vector.load %arg5[%c2_88, %c0_89, %c0_90] : memref<3x128x128xf32, #tpu.memory_space<vmem>>, vector<1x128x128xf32>
    %94 = vector.shape_cast %93 : vector<1x128x128xf32> to vector<128x128xf32>
    %cst_91 = arith.constant dense<0.000000e+00> : vector<8x128xf32>
    %95 = tpu.matmul %92, %94, %cst_91 {dimension_numbers = #tpu.dot_dimension_numbers<[1], [0], [0], [1], [0, 0, 1, 1], [], []>} : vector<8x128xf32>, vector<128x128xf32>, vector<8x128xf32> -> vector<8x128xf32>
    %96 = arith.addf %91, %95 : vector<8x128xf32>
    %97 = arith.addf %44, %96 : vector<8x128xf32>
    %c0_92 = arith.constant 0 : index
    %c0_93 = arith.constant 0 : index
    %98 = vector.load %arg10[%c0_92, %c0_93] : memref<1x128xf32, #tpu.memory_space<vmem>>, vector<1x128xf32>
    %99 = vector.broadcast %98 : vector<1x128xf32> to vector<8x128xf32>
    %100 = arith.mulf %97, %99 : vector<8x128xf32>
    %c0_94 = arith.constant 0 : index
    %c0_95 = arith.constant 0 : index
    %101 = vector.load %arg11[%c0_94, %c0_95] : memref<1x128xf32, #tpu.memory_space<vmem>>, vector<1x128xf32>
    %102 = vector.broadcast %101 : vector<1x128xf32> to vector<8x128xf32>
    %103 = arith.addf %100, %102 : vector<8x128xf32>
    %cst_96 = arith.constant 0.000000e+00 : f32
    %104 = vector.broadcast %cst_96 : f32 to vector<8x128xf32>
    %105 = arith.cmpf ogt, %103, %104 : vector<8x128xf32>
    %cst_97 = arith.constant 0.000000e+00 : f32
    %106 = vector.broadcast %cst_97 : f32 to vector<8x128xf32>
    %107 = arith.minimumf %103, %106 : vector<8x128xf32>
    %108 = math.exp %107 : vector<8x128xf32>
    %cst_98 = arith.constant 1.000000e+00 : f32
    %109 = vector.broadcast %cst_98 : f32 to vector<8x128xf32>
    %110 = arith.subf %108, %109 : vector<8x128xf32>
    %111 = arith.select %105, %103, %110 : vector<8x128xi1>, vector<8x128xf32>
    %c0_99 = arith.constant 0 : index
    %c0_100 = arith.constant 0 : index
    %c0_101 = arith.constant 0 : index
    %112 = vector.load %arg12[%c0_99, %c0_100, %c0_101] : memref<1x8x128xf32, #tpu.memory_space<vmem>>, vector<1x8x128xf32>
    %113 = vector.shape_cast %112 : vector<1x8x128xf32> to vector<8x128xf32>
    %114 = vector.shape_cast %111 : vector<8x128xf32> to vector<1x8x128xf32>
    tpu.vector_store %arg12[%c0_99, %c0_100, %c0_101], %114 {strides = array<i32>} : memref<1x8x128xf32, #tpu.memory_space<vmem>>, vector<1x8x128xf32>,
    return
  }
  func.func @transform_0(%arg0: i32) -> (i32, i32, i32) {
    %c0_i32 = arith.constant 0 : i32
    %c0_i32_0 = arith.constant 0 : i32
    %c0_i32_1 = arith.constant 0 : i32
    return %arg0, %c0_i32, %c0_i32_0 : i32, i32, i32
  }
  func.func @transform_1(%arg0: i32) -> (i32, i32, i32) {
    %c0_i32 = arith.constant 0 : i32
    %c0_i32_0 = arith.constant 0 : i32
    %c0_i32_1 = arith.constant 0 : i32
    return %arg0, %c0_i32, %c0_i32_0 : i32, i32, i32
  }
  func.func @transform_2(%arg0: i32) -> (i32, i32, i32) {
    %c0_i32 = arith.constant 0 : i32
    %c0_i32_0 = arith.constant 0 : i32
    %c0_i32_1 = arith.constant 0 : i32
    %c0_i32_2 = arith.constant 0 : i32
    return %c0_i32, %c0_i32_0, %c0_i32_1 : i32, i32, i32
  }
  func.func @transform_3(%arg0: i32) -> (i32, i32, i32) {
    %c0_i32 = arith.constant 0 : i32
    %c0_i32_0 = arith.constant 0 : i32
    %c0_i32_1 = arith.constant 0 : i32
    %c0_i32_2 = arith.constant 0 : i32
    return %c0_i32, %c0_i32_0, %c0_i32_1 : i32, i32, i32
  }
  func.func @transform_4(%arg0: i32) -> (i32, i32, i32) {
    %c0_i32 = arith.constant 0 : i32
    %c0_i32_0 = arith.constant 0 : i32
    %c0_i32_1 = arith.constant 0 : i32
    %c0_i32_2 = arith.constant 0 : i32
    return %c0_i32, %c0_i32_0, %c0_i32_1 : i32, i32, i32
  }
  func.func @transform_5(%arg0: i32) -> (i32, i32) {
    %c0_i32 = arith.constant 0 : i32
    %c0_i32_0 = arith.constant 0 : i32
    %c0_i32_1 = arith.constant 0 : i32
    return %c0_i32, %c0_i32_0 : i32, i32
  }
  func.func @transform_6(%arg0: i32) -> (i32, i32) {
    %c0_i32 = arith.constant 0 : i32
    %c0_i32_0 = arith.constant 0 : i32
    %c0_i32_1 = arith.constant 0 : i32
    return %c0_i32, %c0_i32_0 : i32, i32
  }
  func.func @transform_7(%arg0: i32) -> (i32, i32) {
    %c0_i32 = arith.constant 0 : i32
    %c0_i32_0 = arith.constant 0 : i32
    %c0_i32_1 = arith.constant 0 : i32
    return %c0_i32, %c0_i32_0 : i32, i32
  }
  func.func @transform_8(%arg0: i32) -> (i32, i32) {
    %c0_i32 = arith.constant 0 : i32
    %c0_i32_0 = arith.constant 0 : i32
    %c0_i32_1 = arith.constant 0 : i32
    return %c0_i32, %c0_i32_0 : i32, i32
  }
  func.func @transform_9(%arg0: i32) -> (i32, i32) {
    %c0_i32 = arith.constant 0 : i32
    %c0_i32_0 = arith.constant 0 : i32
    %c0_i32_1 = arith.constant 0 : i32
    return %c0_i32, %c0_i32_0 : i32, i32
  }
  func.func @transform_10(%arg0: i32) -> (i32, i32) {
    %c0_i32 = arith.constant 0 : i32
    %c0_i32_0 = arith.constant 0 : i32
    %c0_i32_1 = arith.constant 0 : i32
    return %c0_i32, %c0_i32_0 : i32, i32
  }
  func.func @transform_11(%arg0: i32) -> (i32, i32, i32) {
    %c0_i32 = arith.constant 0 : i32
    %c0_i32_0 = arith.constant 0 : i32
    %c0_i32_1 = arith.constant 0 : i32
    return %arg0, %c0_i32, %c0_i32_0 : i32, i32, i32
  }
}

</mosaic_0001>

<bundles_post_ra>
// kernel: tpu_custom_call.1
= control target key start
LH: loop header
LB: loop body
LE: loop exit
PB: predicated region body
PF: predicated region fallthrough
CT: control target
= control target key end

     0   :  { %s1766_s0 = inlined_call_operand.hbm [shape: f32[2,16,128], index: 0, kind: input, shape index: {}]   ;;  %s1767_s1 = inlined_call_operand.hbm [shape: f32[2,16,128], index: 1, kind: input, shape index: {}]   ;;  %s1768_s2 = inlined_call_operand.hbm [shape: f32[5,128,128], index: 2, kind: input, shape index: {}]   ;;  %s1769_s3 = inlined_call_operand.hbm [shape: f32[3,128,128], index: 3, kind: input, shape index: {}]   ;;  %s1770_s4 = inlined_call_operand.hbm [shape: f32[3,128,128], index: 4, kind: input, shape index: {}]   ;;  %s1771_s5 = inlined_call_operand.vmem [shape: f32[1,128], index: 5, kind: input, shape index: {}]   ;;  %s1772_s6 = inlined_call_operand.vmem [shape: f32[1,128], index: 6, kind: input, shape index: {}]   ;;  %s1773_s7 = inlined_call_operand.vmem [shape: f32[1,128], index: 7, kind: input, shape index: {}]   ;;  %s1774_s8 = inlined_call_operand.vmem [shape: f32[1,128], index: 8, kind: input, shape index: {}]   ;;  %s1775_s9 = inlined_call_operand.vmem [shape: f32[1,128], index: 9, kind: input, shape index: {}]   ;;  %s1776_s10 = inlined_call_operand.vmem [shape: f32[1,128], index: 10, kind: input, shape index: {}]   ;;  %s1777_s11 = inlined_call_operand.hbm [shape: f32[2,8,128], index: 11, kind: output, shape index: {}]  }
   0x1   :  { %1787 = sst [smem:[#allocation23_spill]] %s1766_s0 }
   0x2   :  { %1788 = sst [smem:[#allocation24_spill]] %s1768_s2 }
   0x3   :  { %1789 = sst [smem:[#allocation25_spill]] %s1769_s3 }
   0x4   :  { %1790 = sst [smem:[#allocation26_spill]] %s1770_s4 }
   0x5   :  { %16 = vsyncpa [#allocation4], 0 }
   0x6   :  { %18 = vsyncpa [#allocation4 + $0x1], 0 }
   0x7   :  { %19 = vsyncpa [#allocation7], 0 }
   0x8   :  { %21 = vsyncpa [#allocation7 + $0x1], 0 }
   0x9   :  { %22 = vsyncpa [#allocation10], 0 }
   0xa   :  { %23 = vsyncpa [#allocation5], 0 }
   0xb   :  { %25 = vsyncpa [#allocation5 + $0x1], 0  ;;  %s1532_s17 = smov 0   ;;  %s1534_s18 = smov 0  }
   0xc   :  { %s1536_s19 = smov 0   ;;  %s1538_s20 = smov 0  }
   0xd LB: > { %1791 = sst [smem:[#allocation18_spill]] %s1452_s17  ;;  %s1553_s21 = sadd.s32 4294967295, %s1464_s20   ;;  %s1464_s20 = sphi %s1538_s20, %s1811_s20   ;;  %s1460_s19 = sphi %s1536_s19, %s1813_s19   ;;  %s1456_s18 = sphi %s1534_s18, %s1815_s18   ;;  %s1452_s17 = sphi %s1532_s17, %s1814_s17  }
   0xe   : > { %1792 = sst [smem:[#allocation19_spill]] %s1460_s19  ;;  %s1111_s22 = sadd.s32 4294967294, %s1464_s20  }
   0xf   : > { %p51_p0 = scmp.ne.s32.totalorder %s1456_s18, %s1452_s17  ;;  %p52_p1 = scmp.eq.s32.totalorder %s1553_s21, 0 }
  0x10   : > { %p290_p2 = scmp.eq.s32.totalorder %s1553_s21, 1  ;;  %p296_p3 = scmp.eq.s32.totalorder %s1111_s22, 1 }
  0x11   : > { %p1562_p4 = por %p52_p1, %p51_p0  ;;  %p1112_p5 = scmp.ge.s32.totalorder %s1464_s20, 1 }
  0x12   : > { %p1567_p6 = por %p296_p3, %p51_p0  ;;  %p303_p7 = scmp.lt.s32.totalorder %s1464_s20, 3 }
  0x13   : > { %s1796_s2 = sld [smem:[#allocation24_spill]]  ;;  %s1466_s29 = smov [#allocation8]  }
  0x14   : > { %s1794_s24 = scalar_select %p1567_p6, 1, 0 }
  0x15   : > { %p1575_p8 = pnand %p1112_p5, %p303_p7  ;;  %s316_s30 = sshll.u32 %s1466_s29, 4  ;;  %s317_s30 = int_to_ptr.vmem [resolvable:$true] %s316_s30 }
  0x16   : > { %1795 = sst [smem:[#allocation20_spill]] %s1794_s24  ;;  %s1778_s16 = smov 128  }
  0x17   : > { %p1157_p9 = pneg %p1575_p8  ;;  %s1799_s3 = sld [smem:[#allocation25_spill]] }
  0x18   : > { %s1780_s22 = smov 8   ;;  %s1469_s25 = smov [#allocation9]  }
  0x19   : > { %s314_s27 = sshll.u32 %s1796_s2, 4  ;;  %p1583_p10 = pnand %p1157_p9, %p52_p1  ;;  %s315_s27 = int_to_ptr.hbm [resolvable:$true] %s314_s27 }
  0x1a   : > { %s330_s26 = sshll.u32 %s1469_s25, 4  ;;  %s1800_s4 = sld [smem:[#allocation26_spill]]  ;;  %s331_s26 = int_to_ptr.vmem [resolvable:$true] %s330_s26 }
  0x1b   : > { %1160 = dma.hbm_to_vmem [thread:$0]  (!%p1583_p10), %s315_s27, 10240, %s317_s30, [#allocation7], %s1778_s16, %s1778_s16, %s1780_s22  }
  0x1c   : > { %s1470_s27 = smov [#allocation11]   ;;  %s1605_s2 = sadd.s32 1, %s1464_s20  }
  0x1d   : > { %s328_s15 = sshll.u32 %s1799_s3, 4  ;;  %s344_s30 = sshll.u32 %s1470_s27, 4  ;;  %s329_s15 = int_to_ptr.hbm [resolvable:$true] %s328_s15  ;;  %s345_s30 = int_to_ptr.vmem [resolvable:$true] %s344_s30 }
  0x1e   : > { %1163 = dma.hbm_to_vmem [thread:$0]  (!%p1583_p10), %s329_s15, 6144, %s331_s26, [#allocation10], %s1778_s16, %s1778_s16, %s1780_s22  }
  0x1f   : > { %1801 = sst [smem:[#allocation21_spill]] %s1605_s2  ;;  %s35_s25 = ssub.s32 %s1464_s20, %s1605_s2 }
  0x20   : > { %s342_s14 = sshll.u32 %s1800_s4, 4  ;;  %s38_s29 = sadd.s32 1, %s1460_s19  ;;  %s343_s14 = int_to_ptr.hbm [resolvable:$true] %s342_s14 }
  0x21   : > { %1166 = dma.hbm_to_vmem [thread:$0]  (!%p1583_p10), %s343_s14, 6144, %s345_s30, [#allocation10], %s1778_s16, %s1778_s16, %s1780_s22  }
  0x22   : > { %p36_p12 = scmp.eq.s32.totalorder %s35_s25, 0  ;;  %p45_p13 = scmp.ne.s32.totalorder %s1460_s19, %s1456_s18 }
  0x23   : > { %p46_p0 = scmp.eq.s32.totalorder %s1464_s20, 0  ;;  %p1181_p3 = scmp.lt.s32.totalorder %s1464_s20, 2 }
  0x24   : > { %s1620_s15 = scalar_select %p36_p12, %s1460_s19, %s38_s29  }
  0x25   : > { %p47_p5 = por %p46_p0, %p45_p13  ;;  %p1624_p7 = por %p290_p2, %p45_p13 }
  0x26   : > { %1802 = sst [smem:[#allocation22_spill]] %s1620_s15  ;;  %s376_s12 = sand.u32 1, %s1460_s19  }
  0x27   : > { %s1137_s13 = sshll.u32 %s1464_s20, 4  ;;  %s1117_s27 = sshll.u32 %s376_s12, 4 }
  0x28   : > { %s1804_s0 = sld [smem:[#allocation23_spill]]  ;;  %s380_s16 = scalar_lea.vmem [#allocation3], %s1117_s27 }
  0x29   : > { %s388_s22 = sshll.u32 %s380_s16, 4  ;;  %p1635_p9 = pnand %p1181_p3, %p47_p5  ;;  %s389_s22 = int_to_ptr.vmem [resolvable:$true] %s388_s22 }
  0x2a   : > { %s407_s19 = scalar_lea.hbm %s1767_s1, %s1137_s13  ;;  %s402_s2 = scalar_lea.vmem [#allocation6], %s1117_s27 }
  0x2b   : > { %s1642_s24 = sshll.u32 %s402_s2, 4  ;;  %s408_s3 = sshll.u32 %s407_s19, 4  ;;  %s409_s3 = int_to_ptr.hbm [resolvable:$true] %s408_s3  ;;  %s411_s24 = int_to_ptr.vmem [resolvable:$true] %s1642_s24 }
  0x2c   : > { %s377_s14 = scalar_lea.sflag [#allocation4], %s376_s12  ;;  %p1330_p10 = pneg %p1635_p9 }
  0x2e   : > { %s385_s30 = scalar_lea.hbm %s1804_s0, %s1137_s13  ;;  %s1333_s15 = scalar_lea.hbm %s1804_s0, 32 }
  0x2f   : > { %s386_s25 = sshll.u32 %s385_s30, 4  ;;  %s387_s25 = int_to_ptr.hbm [resolvable:$true] %s386_s25 }
  0x30   : > { %s1326_s30 = sshra.s32 %s387_s25, 4  ;;  %s1327_s30 = int_to_ptr.hbm [resolvable:$true] %s1326_s30 }
  0x31   : > { %s1328_s16 = scalar_lea.hbm %s1327_s30, 16  ;;  %p1334_p0 = scmp.lt.s32.totalorder %s1327_s30, %s1804_s0 }
  0x32   : > { %p1329_p2 = scmp.ne.s32.totalorder %s1327_s30, %s1328_s16  ;;  %p1335_p3 = scmp.lt.s32.totalorder %s1333_s15, %s1328_s16 }
  0x34   : > { %p1331_p12 = pnand %p1330_p10, %p1329_p2  ;;  %p1336_p5 = por %p1335_p3, %p1334_p0 }
  0x36   : > { %p1332_p13 = pneg %p1331_p12 }
  0x38   : > { %p1337_p11 = pnand %p1336_p5, %p1332_p13 }
  0x3a   : > { %1340 = shalt.err (!%p1337_p11)
}
  0x3b   : > { %s1806_s2 = smov 8   ;;  %s1807_s19 = smov 128  }
  0x3c   : > { %1170 = dma.hbm_to_vmem [thread:$0]  (!%p1635_p9), %s387_s25, 256, %s389_s22, %s377_s14, %s1807_s19, %s1807_s19, %s1806_s2  }
  0x3d   : > { %s398_s17 = sand.u32 1, %s1464_s20   ;;  %s1356_s4 = sshra.s32 %s409_s3, 4  ;;  %s1357_s4 = int_to_ptr.hbm [resolvable:$true] %s1356_s4 }
  0x3e   : > { %s399_s12 = scalar_lea.sflag [#allocation7], %s398_s17  ;;  %s1358_s30 = scalar_lea.hbm %s1357_s4, 16 }
  0x3f   : > { %p1359_p2 = scmp.ne.s32.totalorder %s1357_s4, %s1358_s30  ;;  %s1363_s13 = scalar_lea.hbm %s1767_s1, 32 }
  0x40   : > { %p1364_p13 = scmp.lt.s32.totalorder %s1357_s4, %s1767_s1  ;;  %p1365_p0 = scmp.lt.s32.totalorder %s1363_s13, %s1358_s30 }
  0x41   : > { %p1361_p11 = pnand %p1359_p2, %p1330_p10 }
  0x42   : > { %p1366_p3 = por %p1365_p0, %p1364_p13 }
  0x43   : > { %p1362_p12 = pneg %p1361_p11 }
  0x45   : > { %p1367_p5 = pnand %p1366_p3, %p1362_p12 }
  0x47   : > { %1370 = shalt.err (!%p1367_p5)
}
  0x48   : > { %1173 = dma.hbm_to_vmem [thread:$0]  (!%p1635_p9), %s409_s3, 256, %s411_s24, %s399_s12, %s1807_s19, %s1807_s19, %s1806_s2  }
  0x49   : > { %422 = sbr.rel (%p1575_p8) target bundleno = 624 (0x270), region = 64  ;;  %s1679_s22 = sand.u32 (!%p1575_p8), 1, %s1456_s18  }
  0x4a   : > { %s1124_s0 = sshll.u32 (!%p1575_p8), %s1679_s22, 4  ;;  %s425_s25 = scalar_lea.sflag (!%p1575_p8), [#allocation4], %s1679_s22 }
  0x4b   : > { %s1683_s14 = scalar_lea.vmem (!%p1575_p8), [#allocation3], %s1124_s0 }
  0x4e   : > { %1431 = dma.done.wait (%p1562_p4), %s425_s25, 256  }
  0x4f   : > { %1433 = vsyncadd (%p1562_p4), %s425_s25, 4294967040  ;;  %s434_s24 = sand.u32 1, %s1553_s21   ;;  %s1690_s29 = scalar_lea.vmem [#allocation6], %s1124_s0 }
  0x50   : > { %s435_s28 = scalar_lea.sflag [#allocation7], %s434_s24 }
  0x51   : > { %1435 = dma.done.wait (%p1562_p4), %s435_s28, 256  }
  0x52   : > { %1437 = vsyncadd (%p1562_p4), %s435_s28, 4294967040 }
  0x53   : > { %1439 = dma.done.wait (%p52_p1), [#allocation7], 10240  }
  0x54   : > { %1441 = vsyncadd (%p52_p1), [#allocation7], 4294957056 }
  0x55   : > { %1443 = dma.done.wait (%p52_p1), [#allocation10], 12288  }
  0x56   : > { %1445 = vsyncadd (%p52_p1), [#allocation10], 4294955008  ;;  %v532_v0 = vld [vmem:[#allocation8 + $0xf8] sm:$0xff]  ;;  %v531_v1 = vld [vmem:[#allocation8 + $0xf0] sm:$0xff]  ;;  %s1129_s0 = sshll.u32 %s1679_s22, 3  ;;  %s1134_s25 = sshll.u32 %s1553_s21, 3 }
  0x57   : > { %533 = vmatpush.msra.mxu0 %v532_v0  ;;  %v530_v2 = vld [vmem:[#allocation8 + $0xe8] sm:$0xff]  ;;  %v590_v3 = vld [vmem:[#allocation8 + $0x178] sm:$0xff]  ;;  %v529_v4 = vld [vmem:[#allocation8 + $0xe0] sm:$0xff]  ;;  %s985_s28 = scalar_lea.hbm %s1777_s11, %s1134_s25  ;;  %s975_s2 = scalar_lea.sflag [#allocation5], %s1679_s22 }
  0x58   : > { %591 = vmatpush.msra.mxu2 %v590_v3  ;;  %v589_v5 = vld [vmem:[#allocation8 + $0x170] sm:$0xff]  ;;  %v629_v6 = vld [vmem:[#allocation8 + $0x1f8] sm:$0xff]  ;;  %v588_v8 = vld [vmem:[#allocation8 + $0x168] sm:$0xff]  ;;  %s989_s3 = sshll.u32 %s985_s28, 4  ;;  %s1406_s4 = scalar_lea.hbm %s1777_s11, 16  ;;  %s990_s3 = int_to_ptr.hbm [resolvable:$true] %s989_s3 }
  0x59   : > { %534 = vmatpush.msra.mxu0 %v531_v1  ;;  %630 = vmatpush.msra.mxu3 %v629_v6  ;;  %v514_v7 = vld [vmem:[#allocation8 + $0x78] sm:$0xff]  ;;  %v628_v9 = vld [vmem:[#allocation8 + $0x1f0] sm:$0xff]  ;;  %v587_v12 = vld [vmem:[#allocation8 + $0x160] sm:$0xff]  ;;  %s1400_s19 = sshra.s32 %s990_s3, 4  ;;  %s1401_s19 = int_to_ptr.hbm [resolvable:$true] %s1400_s19 }
  0x5a   : > { %v528_v10 = vld [vmem:[#allocation8 + $0xd8] sm:$0xff]  ;;  %592 = vmatpush.msra.mxu2 %v589_v5  ;;  %553 = vmatpush.msra.mxu1 %v514_v7  ;;  %v513_v11 = vld [vmem:[#allocation8 + $0x70] sm:$0xff]  ;;  %v627_v13 = vld [vmem:[#allocation8 + $0x1e8] sm:$0xff]  ;;  %s1402_s21 = scalar_lea.hbm %s1401_s19, 8  ;;  %p1407_p9 = scmp.lt.s32.totalorder %s1401_s19, %s1777_s11 }
  0x5b   : > { %535 = vmatpush.msra.mxu0 %v530_v2  ;;  %631 = vmatpush.msra.mxu3 %v628_v9  ;;  %v512_v14 = vld [vmem:[#allocation8 + $0x68] sm:$0xff]  ;;  %v527_v15 = vld [vmem:[#allocation8 + $0xd0] sm:$0xff]  ;;  %v626_v16 = vld [vmem:[#allocation8 + $0x1e0] sm:$0xff]  ;;  %p1403_p1 = scmp.ne.s32.totalorder %s1401_s19, %s1402_s21  ;;  %p1408_p10 = scmp.lt.s32.totalorder %s1406_s4, %s1402_s21 }
  0x5c   : > { %593 = vmatpush.msra.mxu2 %v588_v8  ;;  %554 = vmatpush.msra.mxu1 %v513_v11  ;;  %v586_v17 = vld [vmem:[#allocation8 + $0x158] sm:$0xff]  ;;  %v511_v18 = vld [vmem:[#allocation8 + $0x60] sm:$0xff]  ;;  %v526_v19 = vld [vmem:[#allocation8 + $0xc8] sm:$0xff] }
  0x5d   : > { %536 = vmatpush.msra.mxu0 %v529_v4  ;;  %632 = vmatpush.msra.mxu3 %v627_v13  ;;  %v625_v20 = vld [vmem:[#allocation8 + $0x1d8] sm:$0xff]  ;;  %v585_v21 = vld [vmem:[#allocation8 + $0x150] sm:$0xff]  ;;  %v525_v23 = vld [vmem:[#allocation8 + $0xc0] sm:$0xff]  ;;  %p1404_p4 = pnand %p1403_p1, %p1624_p7  ;;  %p1409_p2 = por %p1408_p10, %p1407_p9 }
  0x5e   : > { %594 = vmatpush.msra.mxu2 %v587_v12  ;;  %555 = vmatpush.msra.mxu1 %v512_v14  ;;  %v510_v22 = vld [vmem:[#allocation8 + $0x58] sm:$0xff]  ;;  %v624_v24 = vld [vmem:[#allocation8 + $0x1d0] sm:$0xff]  ;;  %v584_v25 = vld [vmem:[#allocation8 + $0x148] sm:$0xff] }
  0x5f   : > { %537 = vmatpush.msra.mxu0 %v528_v10  ;;  %633 = vmatpush.msra.mxu3 %v626_v16  ;;  %v509_v26 = vld [vmem:[#allocation8 + $0x50] sm:$0xff]  ;;  %v524_v27 = vld [vmem:[#allocation8 + $0xb8] sm:$0xff]  ;;  %v623_v28 = vld [vmem:[#allocation8 + $0x1c8] sm:$0xff]  ;;  %p1405_p8 = pneg %p1404_p4 }
  0x60   : > { %595 = vmatpush.msra.mxu2 %v586_v17  ;;  %556 = vmatpush.msra.mxu1 %v511_v18  ;;  %v583_v29 = vld [vmem:[#allocation8 + $0x140] sm:$0xff]  ;;  %v508_v30 = vld [vmem:[#allocation8 + $0x48] sm:$0xff]  ;;  %v523_v31 = vld [vmem:[#allocation8 + $0xb0] sm:$0xff] }
  0x61   : > { %538 = vmatpush.msra.mxu0 %v527_v15  ;;  %634 = vmatpush.msra.mxu3 %v625_v20  ;;  %v622_v32 = vld [vmem:[#allocation8 + $0x1c0] sm:$0xff]  ;;  %v582_v33 = vld [vmem:[#allocation8 + $0x138] sm:$0xff]  ;;  %v522_v35 = vld [vmem:[#allocation8 + $0xa8] sm:$0xff]  ;;  %p1410_p11 = pnand %p1409_p2, %p1405_p8 }
  0x62   : > { %596 = vmatpush.msra.mxu2 %v585_v21  ;;  %557 = vmatpush.msra.mxu1 %v510_v22  ;;  %v507_v34 = vld [vmem:[#allocation8 + $0x40] sm:$0xff]  ;;  %v621_v36 = vld [vmem:[#allocation8 + $0x1b8] sm:$0xff]  ;;  %v581_v37 = vld [vmem:[#allocation8 + $0x130] sm:$0xff] }
  0x63   : > { %539 = vmatpush.msra.mxu0 %v526_v19  ;;  %635 = vmatpush.msra.mxu3 %v624_v24  ;;  %v506_v38 = vld [vmem:[#allocation8 + $0x38] sm:$0xff]  ;;  %v521_v39 = vld [vmem:[#allocation8 + $0xa0] sm:$0xff]  ;;  %v620_v40 = vld [vmem:[#allocation8 + $0x1b0] sm:$0xff] }
  0x64   : > { %597 = vmatpush.msra.mxu2 %v584_v25  ;;  %558 = vmatpush.msra.mxu1 %v509_v26  ;;  %v580_v41 = vld [vmem:[#allocation8 + $0x128] sm:$0xff]  ;;  %v505_v42 = vld [vmem:[#allocation8 + $0x30] sm:$0xff]  ;;  %v520_v43 = vld [vmem:[#allocation8 + $0x98] sm:$0xff] }
  0x65   : > { %540 = vmatpush.msra.mxu0 %v525_v23  ;;  %636 = vmatpush.msra.mxu3 %v623_v28  ;;  %v619_v44 = vld [vmem:[#allocation8 + $0x1a8] sm:$0xff]  ;;  %v579_v45 = vld [vmem:[#allocation8 + $0x120] sm:$0xff]  ;;  %v519_v47 = vld [vmem:[#allocation8 + $0x90] sm:$0xff] }
  0x66   : > { %598 = vmatpush.msra.mxu2 %v583_v29  ;;  %559 = vmatpush.msra.mxu1 %v508_v30  ;;  %v504_v46 = vld [vmem:[#allocation8 + $0x28] sm:$0xff]  ;;  %v618_v48 = vld [vmem:[#allocation8 + $0x1a0] sm:$0xff]  ;;  %v578_v50 = vld [vmem:[#allocation8 + $0x118] sm:$0xff] }
  0x67   : > { %541 = vmatpush.msra.mxu0 %v524_v27  ;;  %637 = vmatpush.msra.mxu3 %v622_v32  ;;  %v518_v49 = vld [vmem:[#allocation8 + $0x88] sm:$0xff]  ;;  %v503_v51 = vld [vmem:[#allocation8 + $0x20] sm:$0xff]  ;;  %v577_v53 = vld [vmem:[#allocation8 + $0x110] sm:$0xff] }
  0x68   : > { %599 = vmatpush.msra.mxu2 %v582_v33  ;;  %560 = vmatpush.msra.mxu1 %v507_v34  ;;  %v517_v52 = vld [vmem:[#allocation8 + $0x80] sm:$0xff]  ;;  %v617_v54 = vld [vmem:[#allocation8 + $0x198] sm:$0xff]  ;;  %v576_v57 = vld [vmem:[#allocation8 + $0x108] sm:$0xff] }
  0x69   : > { %542 = vmatpush.msra.mxu0 %v523_v31  ;;  %638 = vmatpush.msra.mxu3 %v621_v36  ;;  %v668_v55 = vld [vmem:[#allocation8 + $0x278] sm:$0xff]  ;;  %v616_v58 = vld [vmem:[#allocation8 + $0x190] sm:$0xff]  ;;  %v615_v60 = vld [vmem:[#allocation8 + $0x188] sm:$0xff] }
  0x6a   : > { %600 = vmatpush.msra.mxu2 %v581_v37  ;;  %561 = vmatpush.msra.mxu1 %v506_v38  ;;  %v502_v56 = vld [vmem:[#allocation8 + $0x18] sm:$0xff]  ;;  %v501_v59 = vld [vmem:[#allocation8 + $0x10] sm:$0xff]  ;;  %v575_v62 = vld [vmem:[#allocation8 + $0x100] sm:$0xff] }
  0x6b   : > { %543 = vmatpush.msra.mxu0 %v522_v35  ;;  %639 = vmatpush.msra.mxu3 %v620_v40  ;;  %v667_v61 = vld [vmem:[#allocation8 + $0x270] sm:$0xff]  ;;  %v500_v0 = vld [vmem:[#allocation8 + $0x8] sm:$0xff]  ;;  %v614_v2 = vld [vmem:[#allocation8 + $0x180] sm:$0xff] }
  0x6c   : > { %601 = vmatpush.msra.mxu2 %v580_v41  ;;  %562 = vmatpush.msra.mxu1 %v505_v42  ;;  %v573_v63 = vld [vmem:[%s1683_s14 + $0x1] sm:$0xff] }
  0x6d   : > { %544 = vmatpush.msra.mxu0 %v521_v39  ;;  %640 = vmatpush.msra.mxu3 %v619_v44  ;;  %v666_v1 = vld [vmem:[#allocation8 + $0x268] sm:$0xff]  ;;  %v499_v4 = vld [vmem:[#allocation8] sm:$0xff]  ;;  %v664_v8 = vld [vmem:[#allocation8 + $0x258] sm:$0xff] }
  0x6e   : > { %602 = vmatpush.msra.mxu2 %v579_v45  ;;  %563 = vmatpush.msra.mxu1 %v504_v46  ;;  %v612_v3 = vld [vmem:[%s1690_s29 + $0x1] sm:$0xff] }
  0x6f   : > { %545 = vmatpush.msra.mxu0 %v520_v43  ;;  %641 = vmatpush.msra.mxu3 %v618_v48  ;;  %v665_v5 = vld [vmem:[#allocation8 + $0x260] sm:$0xff]  ;;  %v663_v9 = vld [vmem:[#allocation8 + $0x250] sm:$0xff]  ;;  %v662_v10 = vld [vmem:[#allocation8 + $0x248] sm:$0xff] }
  0x70   : > { %603 = vmatpush.msra.mxu2 %v578_v50  ;;  %564 = vmatpush.msra.mxu1 %v503_v51  ;;  %v498_v6 = vld [vmem:[%s1683_s14] sm:$0xff]  ;;  %v660_v12 = vld [vmem:[#allocation8 + $0x238] sm:$0xff]  ;;  %v658_v14 = vld [vmem:[#allocation8 + $0x228] sm:$0xff] }
  0x71   : > { %546 = vmatpush.msra.mxu0 %v519_v47  ;;  %642 = vmatpush.msra.mxu3 %v617_v54  ;;  %v515_v7 = vld [vmem:[%s1690_s29] sm:$0xff]  ;;  %v656_v16 = vld [vmem:[#allocation8 + $0x218] sm:$0xff]  ;;  %v654_v18 = vld [vmem:[#allocation8 + $0x208] sm:$0xff]  ;;  %s497_s29 = scalar_lea.vmem [#allocation12], %s1129_s0 }
  0x72   : > { %604 = vmatpush.msra.mxu2 %v577_v53  ;;  %565 = vmatpush.msra.mxu1 %v502_v56  ;;  %v661_v11 = vld [vmem:[#allocation8 + $0x240] sm:$0xff]  ;;  %v659_v13 = vld [vmem:[#allocation8 + $0x230] sm:$0xff]  ;;  %v743_v21 = vld [vmem:[#allocation9 + $0xf8] sm:$0xff]  ;;  %s987_s23 = sshll.u32 %s497_s29, 4  ;;  %s988_s23 = int_to_ptr.vmem [resolvable:$true] %s987_s23 }
  0x73   : > { %547 = vmatpush.msra.mxu0 %v518_v49  ;;  %643 = vmatpush.msra.mxu3 %v616_v58  ;;  %v657_v15 = vld [vmem:[#allocation8 + $0x220] sm:$0xff]  ;;  %v655_v17 = vld [vmem:[#allocation8 + $0x210] sm:$0xff]  ;;  %v725_v22 = vld [vmem:[#allocation9 + $0x78] sm:$0xff] }
  0x74   : > { %605 = vmatpush.msra.mxu2 %v576_v57  ;;  %566 = vmatpush.msra.mxu1 %v501_v59  ;;  %v653_v19 = vld [vmem:[#allocation8 + $0x200] sm:$0xff]  ;;  %v801_v23 = vld [vmem:[#allocation9 + $0x178] sm:$0xff]  ;;  %v742_v24 = vld [vmem:[#allocation9 + $0xf0] sm:$0xff] }
  0x75   : > { %548 = vmatpush.msra.mxu0 %v517_v52  ;;  %644 = vmatpush.msra.mxu3 %v615_v60  ;;  %v651_v20 = vld [vmem:[%s1683_s14 + $0x2] sm:$0xff] }
  0x76   : > { %606 = vmatpush.msra.mxu2 %v575_v62  ;;  %567 = vmatpush.msra.mxu1 %v500_v0  ;;  %v741_v25 = vld [vmem:[#allocation9 + $0xe8] sm:$0xff]  ;;  %v740_v26 = vld [vmem:[#allocation9 + $0xe0] sm:$0xff]  ;;  %v739_v27 = vld [vmem:[#allocation9 + $0xd8] sm:$0xff] }
  0x77   : > { %669 = vmatpush.msrb.mxu0 %v668_v55  ;;  %607 = vmatmul.f32.vlgmr.msra.gmra.mxu2 %v573_v63  ;;  %v724_v28 = vld [vmem:[#allocation9 + $0x70] sm:$0xff]  ;;  %v723_v31 = vld [vmem:[#allocation9 + $0x68] sm:$0xff]  ;;  %v722_v34 = vld [vmem:[#allocation9 + $0x60] sm:$0xff]  ;;  %v1471_v63 = vmov 0.0  }
  0x78   : > { %645 = vmatpush.msra.mxu3 %v614_v2  ;;  %568 = vmatpush.msra.mxu1 %v499_v4  ;;  %v800_v29 = vld [vmem:[#allocation9 + $0x170] sm:$0xff]  ;;  %v799_v32 = vld [vmem:[#allocation9 + $0x168] sm:$0xff]  ;;  %v798_v35 = vld [vmem:[#allocation9 + $0x160] sm:$0xff]  ;;  %706 = vst [vmem:[#allocation2] sm:$0xff] %v1471_v63 }
  0x79   : > { %670 = vmatpush.msrb.mxu0 %v667_v61  ;;  %646 = vmatmul.f32.vlgmr.msra.gmra.mxu3 %v612_v3  ;;  %v738_v30 = vld [vmem:[#allocation9 + $0xd0] sm:$0xff]  ;;  %v737_v33 = vld [vmem:[#allocation9 + $0xc8] sm:$0xff]  ;;  %v736_v36 = vld [vmem:[#allocation9 + $0xc0] sm:$0xff]  ;;  %707 = vst [vmem:[#allocation2 + $0x8] sm:$0xff] %v1471_v63 }
  0x7a   : > { %569 = vmatmul.f32.vlgmr.msra.gmra.mxu1 %v498_v6  ;;  %549 = vmatmul.f32.vlgmr.msra.gmra.mxu0 %v515_v7  ;;  %v721_v37 = vld [vmem:[#allocation9 + $0x58] sm:$0xff]  ;;  %v720_v40 = vld [vmem:[#allocation9 + $0x50] sm:$0xff]  ;;  %v719_v43 = vld [vmem:[#allocation9 + $0x48] sm:$0xff] }
  0x7b   : > { %671 = vmatpush.msrb.mxu0 %v666_v1  ;;  %744 = vmatpush.msrb.mxu1 %v743_v21  ;;  %v797_v38 = vld [vmem:[#allocation9 + $0x158] sm:$0xff]  ;;  %v796_v41 = vld [vmem:[#allocation9 + $0x150] sm:$0xff]  ;;  %v795_v44 = vld [vmem:[#allocation9 + $0x148] sm:$0xff] }
  0x7c   : > { %764 = vmatpush.msrb.mxu2 %v725_v22  ;;  %802 = vmatpush.msrb.mxu3 %v801_v23  ;;  %v735_v39 = vld [vmem:[#allocation9 + $0xb8] sm:$0xff]  ;;  %v734_v42 = vld [vmem:[#allocation9 + $0xb0] sm:$0xff]  ;;  %v733_v45 = vld [vmem:[#allocation9 + $0xa8] sm:$0xff] }
  0x7d   : > { %672 = vmatpush.msrb.mxu0 %v665_v5  ;;  %745 = vmatpush.msrb.mxu1 %v742_v24  ;;  %v718_v46 = vld [vmem:[#allocation9 + $0x40] sm:$0xff]  ;;  %v717_v49 = vld [vmem:[#allocation9 + $0x38] sm:$0xff]  ;;  %v716_v52 = vld [vmem:[#allocation9 + $0x30] sm:$0xff] }
  0x7e   : > { %765 = vmatpush.msrb.mxu2 %v724_v28  ;;  %803 = vmatpush.msrb.mxu3 %v800_v29  ;;  %v794_v47 = vld [vmem:[#allocation9 + $0x140] sm:$0xff]  ;;  %v793_v50 = vld [vmem:[#allocation9 + $0x138] sm:$0xff]  ;;  %v792_v53 = vld [vmem:[#allocation9 + $0x130] sm:$0xff] }
  0x7f   : > { %673 = vmatpush.msrb.mxu0 %v664_v8  ;;  %746 = vmatpush.msrb.mxu1 %v741_v25  ;;  %v732_v48 = vld [vmem:[#allocation9 + $0xa0] sm:$0xff]  ;;  %v731_v51 = vld [vmem:[#allocation9 + $0x98] sm:$0xff]  ;;  %v730_v54 = vld [vmem:[#allocation9 + $0x90] sm:$0xff] }
  0x80   : > { %766 = vmatpush.msrb.mxu2 %v723_v31  ;;  %804 = vmatpush.msrb.mxu3 %v799_v32  ;;  %v715_v55 = vld [vmem:[#allocation9 + $0x28] sm:$0xff]  ;;  %v714_v58 = vld [vmem:[#allocation9 + $0x20] sm:$0xff]  ;;  %v713_v0 = vld [vmem:[#allocation9 + $0x18] sm:$0xff] }
  0x81   : > { %674 = vmatpush.msrb.mxu0 %v663_v9  ;;  %747 = vmatpush.msrb.mxu1 %v740_v26  ;;  %v791_v56 = vld [vmem:[#allocation9 + $0x128] sm:$0xff]  ;;  %v790_v59 = vld [vmem:[#allocation9 + $0x120] sm:$0xff]  ;;  %v789_v1 = vld [vmem:[#allocation9 + $0x118] sm:$0xff] }
  0x82   : > { %767 = vmatpush.msrb.mxu2 %v722_v34  ;;  %805 = vmatpush.msrb.mxu3 %v798_v35  ;;  %v729_v57 = vld [vmem:[#allocation9 + $0x88] sm:$0xff]  ;;  %v728_v60 = vld [vmem:[#allocation9 + $0x80] sm:$0xff]  ;;  %v712_v2 = vld [vmem:[#allocation9 + $0x10] sm:$0xff] }
  0x83   : > { %675 = vmatpush.msrb.mxu0 %v662_v10  ;;  %748 = vmatpush.msrb.mxu1 %v739_v27  ;;  %v788_v3 = vld [vmem:[#allocation9 + $0x110] sm:$0xff]  ;;  %v711_v5 = vld [vmem:[#allocation9 + $0x8] sm:$0xff]  ;;  %v710_v8 = vld [vmem:[#allocation9] sm:$0xff] }
  0x84   : > { %768 = vmatpush.msrb.mxu2 %v721_v37  ;;  %806 = vmatpush.msrb.mxu3 %v797_v38  ;;  %v787_v6 = vld [vmem:[#allocation9 + $0x108] sm:$0xff]  ;;  %v786_v9 = vld [vmem:[#allocation9 + $0x100] sm:$0xff]  ;;  %v876_v26 = vld [vmem:[#allocation11 + $0xf8] sm:$0xff] }
  0x85   : > { %676 = vmatpush.msrb.mxu0 %v661_v11  ;;  %749 = vmatpush.msrb.mxu1 %v738_v30  ;;  %v875_v27 = vld [vmem:[#allocation11 + $0xf0] sm:$0xff]  ;;  %v874_v28 = vld [vmem:[#allocation11 + $0xe8] sm:$0xff]  ;;  %v873_v29 = vld [vmem:[#allocation11 + $0xe0] sm:$0xff] }
  0x86   : > { %769 = vmatpush.msrb.mxu2 %v720_v40  ;;  %807 = vmatpush.msrb.mxu3 %v796_v41  ;;  %v858_v30 = vld [vmem:[#allocation11 + $0x78] sm:$0xff]  ;;  %v933_v34 = vld [vmem:[#allocation11 + $0x170] sm:$0xff]  ;;  %v932_v37 = vld [vmem:[#allocation11 + $0x168] sm:$0xff] }
  0x87   : > { %677 = vmatpush.msrb.mxu0 %v660_v12  ;;  %750 = vmatpush.msrb.mxu1 %v737_v33  ;;  %v934_v31 = vld [vmem:[#allocation11 + $0x178] sm:$0xff]  ;;  %v857_v33 = vld [vmem:[#allocation11 + $0x70] sm:$0xff]  ;;  %v870_v38 = vld [vmem:[#allocation11 + $0xc8] sm:$0xff] }
  0x88   : > { %770 = vmatpush.msrb.mxu2 %v719_v43  ;;  %808 = vmatpush.msrb.mxu3 %v795_v44  ;;  %v872_v32 = vld [vmem:[#allocation11 + $0xd8] sm:$0xff]  ;;  %v871_v35 = vld [vmem:[#allocation11 + $0xd0] sm:$0xff]  ;;  %v931_v40 = vld [vmem:[#allocation11 + $0x160] sm:$0xff] }
  0x89   : > { %678 = vmatpush.msrb.mxu0 %v659_v13  ;;  %751 = vmatpush.msrb.mxu1 %v736_v36  ;;  %v1224_v13 = vld [vmem:[%s1771_s5] ss:$0 sm:$0xff]  ;;  %v856_v36 = vld [vmem:[#allocation11 + $0x68] sm:$0xff]  ;;  %v869_v41 = vld [vmem:[#allocation11 + $0xc0] sm:$0xff] }
  0x8a   : > { %771 = vmatpush.msrb.mxu2 %v718_v46  ;;  %809 = vmatpush.msrb.mxu3 %v794_v47  ;;  %v930_v43 = vld [vmem:[#allocation11 + $0x158] sm:$0xff]  ;;  %v929_v46 = vld [vmem:[#allocation11 + $0x150] sm:$0xff] }
  0x8b   : > { %679 = vmatpush.msrb.mxu0 %v658_v14  ;;  %752 = vmatpush.msrb.mxu1 %v735_v39  ;;  %v855_v39 = vld [vmem:[#allocation11 + $0x60] sm:$0xff]  ;;  %v868_v44 = vld [vmem:[#allocation11 + $0xb8] sm:$0xff]  ;;  %v867_v47 = vld [vmem:[#allocation11 + $0xb0] sm:$0xff] }
  0x8c   : > { %772 = vmatpush.msrb.mxu2 %v717_v49  ;;  %810 = vmatpush.msrb.mxu3 %v793_v50  ;;  %v928_v49 = vld [vmem:[#allocation11 + $0x148] sm:$0xff] }
  0x8d   : > { %680 = vmatpush.msrb.mxu0 %v657_v15  ;;  %753 = vmatpush.msrb.mxu1 %v734_v42  ;;  %v854_v42 = vld [vmem:[#allocation11 + $0x58] sm:$0xff]  ;;  %v866_v50 = vld [vmem:[#allocation11 + $0xa8] sm:$0xff] }
  0x8e   : > { %773 = vmatpush.msrb.mxu2 %v716_v52  ;;  %811 = vmatpush.msrb.mxu3 %v792_v53  ;;  %v927_v52 = vld [vmem:[#allocation11 + $0x140] sm:$0xff] }
  0x8f   : > { %681 = vmatpush.msrb.mxu0 %v656_v16  ;;  %754 = vmatpush.msrb.mxu1 %v733_v45  ;;  %v1225_v16 = vld [vmem:[%s1772_s6] ss:$0 sm:$0xff]  ;;  %v865_v53 = vld [vmem:[#allocation11 + $0xa0] sm:$0xff] }
  0x90   : > { %774 = vmatpush.msrb.mxu2 %v715_v55  ;;  %812 = vmatpush.msrb.mxu3 %v791_v56  ;;  %v853_v45 = vld [vmem:[#allocation11 + $0x50] sm:$0xff]  ;;  %v926_v55 = vld [vmem:[#allocation11 + $0x138] sm:$0xff] }
  0x91   : > { %682 = vmatpush.msrb.mxu0 %v655_v17  ;;  %755 = vmatpush.msrb.mxu1 %v732_v48  ;;  %v852_v48 = vld [vmem:[#allocation11 + $0x48] sm:$0xff]  ;;  %v864_v56 = vld [vmem:[#allocation11 + $0x98] sm:$0xff] }
  0x92   : > { %775 = vmatpush.msrb.mxu2 %v714_v58  ;;  %813 = vmatpush.msrb.mxu3 %v790_v59  ;;  %v925_v58 = vld [vmem:[#allocation11 + $0x130] sm:$0xff] }
  0x93   : > { %683 = vmatpush.msrb.mxu0 %v654_v18  ;;  %756 = vmatpush.msrb.mxu1 %v731_v51  ;;  %v851_v51 = vld [vmem:[#allocation11 + $0x40] sm:$0xff]  ;;  %v863_v59 = vld [vmem:[#allocation11 + $0x90] sm:$0xff] }
  0x94   : > { %776 = vmatpush.msrb.mxu2 %v713_v0  ;;  %814 = vmatpush.msrb.mxu3 %v789_v1  ;;  %v923_v0 = vld [vmem:[#allocation11 + $0x120] sm:$0xff] }
  0x95   : > { %684 = vmatpush.msrb.mxu0 %v653_v19  ;;  %757 = vmatpush.msrb.mxu1 %v730_v54  ;;  %v850_v54 = vld [vmem:[#allocation11 + $0x38] sm:$0xff]  ;;  %v861_v1 = vld [vmem:[#allocation11 + $0x80] sm:$0xff] }
  0x96   : > { %685 = vmatmul.f32.vlgmr.msrb.gmra.mxu0 %v651_v20  ;;  %777 = vmatpush.msrb.mxu2 %v712_v2  ;;  %v846_v2 = vld [vmem:[#allocation11 + $0x18] sm:$0xff] }
  0x97   : > { %758 = vmatpush.msrb.mxu1 %v729_v57  ;;  %815 = vmatpush.msrb.mxu3 %v788_v3  ;;  %v849_v57 = vld [vmem:[#allocation11 + $0x30] sm:$0xff]  ;;  %v922_v3 = vld [vmem:[#allocation11 + $0x118] sm:$0xff] }
  0x98   : > { %778 = vmatpush.msrb.mxu2 %v711_v5  ;;  %877 = vmatpush.msra.mxu0 %v876_v26  ;;  %v921_v5 = vld [vmem:[#allocation11 + $0x110] sm:$0xff] }
  0x99   : > { %759 = vmatpush.msrb.mxu1 %v728_v60  ;;  %816 = vmatpush.msrb.mxu3 %v787_v6  ;;  %v848_v60 = vld [vmem:[#allocation11 + $0x28] sm:$0xff] }
  0x9a   : > { %779 = vmatpush.msrb.mxu2 %v710_v8  ;;  %878 = vmatpush.msra.mxu0 %v875_v27  ;;  %v844_v6 = vld [vmem:[#allocation11 + $0x8] sm:$0xff]  ;;  %v843_v8 = vld [vmem:[#allocation11] sm:$0xff] }
  0x9b   : > { %817 = vmatpush.msrb.mxu3 %v786_v9  ;;  %897 = vmatpush.msra.mxu1 %v858_v30  ;;  %v919_v9 = vld [vmem:[#allocation11 + $0x100] sm:$0xff] }
  0x9c   : > { %879 = vmatpush.msra.mxu0 %v874_v28  ;;  %935 = vmatpush.msra.mxu2 %v934_v31 }
  0x9d   : > { %898 = vmatpush.msra.mxu1 %v857_v33 }
  0x9e   : > { %880 = vmatpush.msra.mxu0 %v873_v29  ;;  %936 = vmatpush.msra.mxu2 %v933_v34  ;;  %v1229_v34 = vld [vmem:[%s1776_s10] ss:$0 sm:$0xff] }
  0x9f   : > { %899 = vmatpush.msra.mxu1 %v856_v36 }
  0xa0   : > { %881 = vmatpush.msra.mxu0 %v872_v32  ;;  %937 = vmatpush.msra.mxu2 %v932_v37  ;;  %v1228_v32 = vld [vmem:[%s1775_s9] ss:$0 sm:$0xff] }
  0xa1   : > { %900 = vmatpush.msra.mxu1 %v855_v39 }
  0xa2   : > { %882 = vmatpush.msra.mxu0 %v871_v35  ;;  %938 = vmatpush.msra.mxu2 %v931_v40 }
  0xa3   : > { %901 = vmatpush.msra.mxu1 %v854_v42 }
  0xa4   : > { %883 = vmatpush.msra.mxu0 %v870_v38  ;;  %939 = vmatpush.msra.mxu2 %v930_v43 }
  0xa5   : > { %902 = vmatpush.msra.mxu1 %v853_v45 }
  0xa6   : > { %884 = vmatpush.msra.mxu0 %v869_v41  ;;  %940 = vmatpush.msra.mxu2 %v929_v46 }
  0xa7   : > { %903 = vmatpush.msra.mxu1 %v852_v48 }
  0xa8   : > { %885 = vmatpush.msra.mxu0 %v868_v44  ;;  %941 = vmatpush.msra.mxu2 %v928_v49 }
  0xa9   : > { %904 = vmatpush.msra.mxu1 %v851_v51 }
  0xaa   : > { %886 = vmatpush.msra.mxu0 %v867_v47  ;;  %942 = vmatpush.msra.mxu2 %v927_v52 }
  0xab   : > { %905 = vmatpush.msra.mxu1 %v850_v54 }
  0xac   : > { %887 = vmatpush.msra.mxu0 %v866_v50  ;;  %943 = vmatpush.msra.mxu2 %v926_v55 }
  0xad   : > { %906 = vmatpush.msra.mxu1 %v849_v57 }
  0xae   : > { %888 = vmatpush.msra.mxu0 %v865_v53  ;;  %944 = vmatpush.msra.mxu2 %v925_v58 }
  0xaf   : > { %907 = vmatpush.msra.mxu1 %v848_v60 }
  0xb0   : > { %889 = vmatpush.msra.mxu0 %v864_v56 }
  0xb2   : > { %890 = vmatpush.msra.mxu0 %v863_v59 }
  0xf7   : > { %v550_v61 = vpop.f32.mrf.mxu0  ;;  %v570_v62 = vpop.f32.mrf.mxu1 }
  0xf8   : > { %v571_v4 = vadd.f32 %v570_v62, %v550_v61  ;;  %v924_v61 = vld [vmem:[#allocation11 + $0x128] sm:$0xff] }
  0xf9   : > { %v862_v62 = vld [vmem:[#allocation11 + $0x88] sm:$0xff]  ;;  %945 = vmatpush.msra.mxu2 %v924_v61 }
  0xfa   : > { %v608_v7 = vpop.f32.mrf.mxu2  ;;  %891 = vmatpush.msra.mxu0 %v862_v62 }
  0xfb   : > { %v611_v10 = vadd.f32 %v608_v7, %v571_v4  ;;  %946 = vmatpush.msra.mxu2 %v923_v0  ;;  %v845_v4 = vld [vmem:[#allocation11 + $0x10] sm:$0xff]  ;;  %v920_v7 = vld [vmem:[#allocation11 + $0x108] sm:$0xff] }
  0xfc   : > { %v647_v11 = vpop.f32.mrf.mxu3  ;;  %892 = vmatpush.msra.mxu0 %v861_v1 }
  0xfd   : > { %v650_v12 = vadd.f32 %v647_v11, %v611_v10  ;;  %947 = vmatpush.msra.mxu2 %v922_v3 }
  0xff   : > { %948 = vmatpush.msra.mxu2 %v921_v5 }
 0x101   : > { %949 = vmatpush.msra.mxu2 %v920_v7 }
 0x103   : > { %950 = vmatpush.msra.mxu2 %v919_v9 }
 0x113   : > { %v686_v14 = vpop.f32.mrf.mxu0 }
 0x114   : > { %v689_v15 = vadd.f32 %v686_v14, %v650_v12 }
 0x116   : > { %v694_v17 = vmul.f32 %v1224_v13, %v689_v15  ;;  %v1226_v13 = vld [vmem:[%s1773_s7] ss:$0 sm:$0xff] }
 0x118   : > { %v699_v18 = vadd.f32 %v1225_v16, %v694_v17  ;;  %v1227_v16 = vld [vmem:[%s1774_s8] ss:$0 sm:$0xff] }
 0x11a   : > { %v701_v19 = vmin.f32 %v699_v18, 0.0  ;;  %vm700_vm0 = vcmp.gt.f32.partialorder %v699_v18, 0.0 }
 0x11c   : > { %v702_v20 = vmul.f32 1.442695, %v701_v19 }
 0x11e   : > { %1230 = vpow2.f32 %v702_v20 }
 0x124   : > { %v1231_v21 = vpop.eup %1230 }
 0x125   : > { %v1130_v22 = vadd.f32 -1.0, %v1231_v21 }
 0x127   : > { %v1715_v23 = vsel %vm700_vm0, %v699_v18, %v1130_v22 }
 0x128   : > { %708 = vst [vmem:[#allocation2 + $0x1] sm:$0xff] %v1715_v23  ;;  %760 = vmatmul.f32.vlgmr.msrb.gmra.mxu1 %v1715_v23 }
 0x12f   : > { %v709_v24 = vld [vmem:[#allocation2] sm:$0xff] }
 0x130   : > { %v784_v25 = vld [vmem:[#allocation2 + $0x2] sm:$0xff]  ;;  %780 = vmatmul.f32.vlgmr.msrb.gmra.mxu2 %v709_v24 }
 0x131   : > { %818 = vmatmul.f32.vlgmr.msrb.gmra.mxu3 %v784_v25  ;;  %839 = vst [vmem:[#allocation2] sm:$0xff] %v1471_v63 }
 0x132   : > { %840 = vst [vmem:[#allocation2 + $0x8] sm:$0xff] %v1471_v63  ;;  %v847_v63 = vld [vmem:[#allocation11 + $0x20] sm:$0xff] }
 0x133   : > { %908 = vmatpush.msra.mxu1 %v847_v63 }
 0x135   : > { %909 = vmatpush.msra.mxu1 %v846_v2 }
 0x137   : > { %910 = vmatpush.msra.mxu1 %v845_v4 }
 0x139   : > { %911 = vmatpush.msra.mxu1 %v844_v6 }
 0x13b   : > { %912 = vmatpush.msra.mxu1 %v843_v8 }
 0x1a5   : > { %v761_v10 = vpop.f32.mrf.mxu1 }
 0x1b3   : > { %v781_v11 = vpop.f32.mrf.mxu2 }
 0x1b4   : > { %v782_v12 = vadd.f32 %v781_v11, %v761_v10  ;;  %v819_v14 = vpop.f32.mrf.mxu3 }
 0x1b6   : > { %v822_v15 = vadd.f32 %v819_v14, %v782_v12 }
 0x1b8   : > { %v827_v17 = vmul.f32 %v1226_v13, %v822_v15 }
 0x1ba   : > { %v832_v18 = vadd.f32 %v1227_v16, %v827_v17 }
 0x1bc   : > { %v834_v19 = vmin.f32 %v832_v18, 0.0  ;;  %vm833_vm1 = vcmp.gt.f32.partialorder %v832_v18, 0.0 }
 0x1be   : > { %v835_v20 = vmul.f32 1.442695, %v834_v19 }
 0x1c0   : > { %1232 = vpow2.f32 %v835_v20 }
 0x1c6   : > { %v1233_v21 = vpop.eup %1232 }
 0x1c7   : > { %v1131_v22 = vadd.f32 -1.0, %v1233_v21 }
 0x1c9   : > { %v838_v24 = vsel %vm833_vm1, %v832_v18, %v1131_v22 }
 0x1ca   : > { %841 = vst [vmem:[#allocation2 + $0x1] sm:$0xff] %v838_v24  ;;  %893 = vmatmul.f32.vlgmr.msra.gmra.mxu0 %v838_v24 }
 0x1d1   : > { %v842_v25 = vld [vmem:[#allocation2] sm:$0xff] }
 0x1d2   : > { %v917_v26 = vld [vmem:[#allocation2 + $0x2] sm:$0xff]  ;;  %913 = vmatmul.f32.vlgmr.msra.gmra.mxu1 %v842_v25 }
 0x1d3   : > { %951 = vmatmul.f32.vlgmr.msra.gmra.mxu2 %v917_v26 }
 0x247   : > { %v894_v28 = vpop.f32.mrf.mxu0 }
 0x24f   : > { %v914_v27 = vpop.f32.mrf.mxu1 }
 0x250   : > { %v915_v29 = vadd.f32 %v914_v27, %v894_v28 }
 0x256   : > { %v952_v30 = vpop.f32.mrf.mxu2 }
 0x257   : > { %v955_v31 = vadd.f32 %v952_v30, %v915_v29 }
 0x259   : > { %v956_v33 = vadd.f32 %v955_v31, %v1715_v23 }
 0x25b   : > { %v961_v35 = vmul.f32 %v1228_v32, %v956_v33 }
 0x25d   : > { %v966_v36 = vadd.f32 %v1229_v34, %v961_v35 }
 0x25f   : > { %v968_v37 = vmin.f32 %v966_v36, 0.0  ;;  %vm967_vm2 = vcmp.gt.f32.partialorder %v966_v36, 0.0 }
 0x261   : > { %v969_v38 = vmul.f32 1.442695, %v968_v37 }
 0x263   : > { %1234 = vpow2.f32 %v969_v38 }
 0x269   : > { %v1235_v23 = vpop.eup %1234 }
 0x26a   : > { %v1132_v39 = vadd.f32 -1.0, %v1235_v23 }
 0x26c   : > { %v972_v40 = vsel %vm967_vm2, %v966_v36, %v1132_v39 }
 0x26d   : > { %973 = vst [vmem:[%s497_s29] sm:$0xff] %v972_v40 }
 0x26e   : > { %1413 = shalt.err (!%p1410_p11)
}
 0x26f   : > { %1155 = dma.vmem_to_hbm [thread:$0]  (%p1624_p7), %s988_s23, 128, %s990_s3, %s975_s2  }
 0x270 PF: > { %s1808_s22 = sld [smem:[#allocation18_spill]]  ;;  %p1810_p12 = scmp.ge.s32.totalorder %s1464_s20, 2 }
 0x272   : > { %p1175_p13 = pnand %p1810_p12, %p1567_p6 }
 0x274   : > { %p1176_p0 = pneg %p1175_p13 }
 0x276   : > { %s1001_s13 = sand.u32 1, %s1808_s22  }
 0x277   : > { %s1002_s27 = scalar_lea.sflag [#allocation5], %s1001_s13 }
 0x278   : > { %1447 = dma.done.wait (%p1176_p0), %s1002_s27, 128  }
 0x279   : > { %1449 = vsyncadd (%p1176_p0), %s1002_s27, 4294967168  ;;  %s1811_s20 = sld [smem:[#allocation21_spill]]  ;;  %s1814_s17 = smov %s1456_s18 }
 0x27a   : > { %s1812_s0 = sld [smem:[#allocation19_spill]] }
 0x27b   : > { %s1813_s19 = sld [smem:[#allocation22_spill]] }
 0x27f   : > { %p28_p3 = scmp.ge.s32.totalorder %s1811_s20, 4  }
 0x280   : > { %s1815_s18 = smov %s1812_s0 }
 0x281   :  { %30 = sbr.rel (!%p28_p3) target bundleno = 13 (0xd), region = 142 }
 0x286   :  { %1008 = vsyncpa [#allocation4], 1 }
 0x287   :  { %1010 = vsyncpa [#allocation4 + $0x1], 1 }
 0x288   :  { %1011 = vsyncpa [#allocation7], 1 }
 0x289   :  { %1013 = vsyncpa [#allocation7 + $0x1], 1 }
 0x28a   :  { %1014 = vsyncpa [#allocation10], 1 }
 0x28b   :  { %1015 = vsyncpa [#allocation5], 1 }
 0x28c   :  { %1017 = vsyncpa [#allocation5 + $0x1], 1 }

</bundles_post_ra>
